<compile_context>
chip_gen: v6e
topology: v6e:2x2x1
jax: 0.10.0
libtpu: 0.0.40
codegen_flags: <defaults>
</compile_context>

<pallas_src>
import jax
import jax.numpy as jnp
from jax.experimental import pallas as pl
from jax.experimental.pallas import tpu as pltpu

IN_F, H1_F, H2_F, OUT_F = 784, 200, 50, 10       # logical dims (PyTorch module)
IN_P, H1_P, H2_P, OUT_P = 896, 256, 128, 128     # lane-padded dims (multiples of 128)
NEG_BIG = -1e30                                   # bias for padded logit lanes
MAX_TB = 512                                      # max batch-tile rows


def binary_net_kernel(x_ref, w1_ref, b1_ref, w2_ref, b2_ref, w3_ref, b3_ref,
                      out_ref):
    # x tile: (TB, 896) bf16; weights/biases resident in VMEM across batch tiles.
    x = x_ref[...]
    # fc1 (bf16 x bf16 -> f32 accumulate) + relu
    h1 = jnp.dot(x, w1_ref[...], preferred_element_type=jnp.float32) + b1_ref[...]
    h1 = jnp.maximum(h1, 0.0)
    # fc2 + relu (f32; small matmul, hidden activations kept f32 for accuracy)
    h2 = jnp.dot(h1, w2_ref[...], preferred_element_type=jnp.float32) + b2_ref[...]
    h2 = jnp.maximum(h2, 0.0)
    # fc3; padded lanes carry a -1e30 bias so exp() kills them in the softmax
    logits = jnp.dot(h2, w3_ref[...], preferred_element_type=jnp.float32) + b3_ref[...]
    m = jnp.max(logits, axis=-1, keepdims=True)
    e = jnp.exp(logits - m)
    denom = jnp.sum(e, axis=-1, keepdims=True)
    out_ref[...] = e * pl.reciprocal(denom, approx=True)


def _round_up(n, m):
    return (n + m - 1) // m * m


def binarize(a):
    # forward-pre-hook semantics: w > 0 -> +1 else -1
    return jnp.where(a > 0, 1.0, -1.0).astype(jnp.float32)


def make_params(key):
    k1, k2, k3, k4, k5, k6 = jax.random.split(key, 6)
    # deterministic "random" init, binarized exactly like the PyTorch hook does
    w1 = binarize(jax.random.normal(k1, (IN_F, H1_F), jnp.float32))
    b1 = binarize(jax.random.normal(k2, (H1_F,), jnp.float32))
    w2 = binarize(jax.random.normal(k3, (H1_F, H2_F), jnp.float32))
    b2 = binarize(jax.random.normal(k4, (H2_F,), jnp.float32))
    w3 = binarize(jax.random.normal(k5, (H2_F, OUT_F), jnp.float32))
    b3 = binarize(jax.random.normal(k6, (OUT_F,), jnp.float32))
    return w1, b1, w2, b2, w3, b3


def pad_params(params):
    """Lane-pad the binarized parameters for the kernel (done once, offline)."""
    w1, b1, w2, b2, w3, b3 = params
    w1p = jnp.zeros((IN_P, H1_P), jnp.float32).at[:IN_F, :H1_F].set(w1)
    b1p = jnp.zeros((1, H1_P), jnp.float32).at[0, :H1_F].set(b1)
    w2p = jnp.zeros((H1_P, H2_P), jnp.float32).at[:H1_F, :H2_F].set(w2)
    b2p = jnp.zeros((1, H2_P), jnp.float32).at[0, :H2_F].set(b2)
    w3p = jnp.zeros((H2_P, OUT_P), jnp.float32).at[:H2_F, :OUT_F].set(w3)
    # padded logit lanes get a huge negative bias -> exp() == 0 under softmax
    b3p = jnp.full((1, OUT_P), NEG_BIG, jnp.float32).at[0, :OUT_F].set(b3)
    # +/-1 is exact in bf16; fc1 runs on the bf16 MXU path (v6e/v7x friendly, no int8).
    return (w1p.astype(jnp.bfloat16), b1p, w2p, b2p, w3p, b3p)


def binary_net_forward(x, padded_params):
    w1, b1, w2, b2, w3, b3 = padded_params
    # x may be (N, 1, 28, 28) or (N, 784); emulate x.view(-1, 784)
    x2d = x.reshape(-1, IN_F).astype(jnp.float32)
    batch = x2d.shape[0]

    # batch tile: multiple of 16 (bf16 sublane packing), capped so double-buffered
    # x/out tiles + weights stay far below v7x's 64 MiB VMEM.
    tb = min(MAX_TB, _round_up(batch, 16))
    pb = _round_up(batch, tb)

    # pad batch to a tile multiple and features 784 -> 896 (7*128), cast to bf16
    # (halves the dominant HBM->VMEM activation stream).
    xp = jnp.zeros((pb, IN_P), jnp.bfloat16)
    xp = xp.at[:batch, :IN_F].set(x2d.astype(jnp.bfloat16))

    const = lambda i: (0, 0)  # weights/biases stay resident across batch tiles
    out = pl.pallas_call(
        binary_net_kernel,
        out_shape=jax.ShapeDtypeStruct((pb, OUT_P), jnp.float32),
        grid=(pb // tb,),
        in_specs=[
            pl.BlockSpec((tb, IN_P), lambda i: (i, 0)),   # x tile (pipelined)
            pl.BlockSpec((IN_P, H1_P), const),            # W1 (bf16)
            pl.BlockSpec((1, H1_P), const),               # b1
            pl.BlockSpec((H1_P, H2_P), const),            # W2
            pl.BlockSpec((1, H2_P), const),               # b2
            pl.BlockSpec((H2_P, OUT_P), const),           # W3
            pl.BlockSpec((1, OUT_P), const),              # b3
        ],
        out_specs=pl.BlockSpec((tb, OUT_P), lambda i: (i, 0)),  # lane-dense store
        compiler_params=pltpu.CompilerParams(
            dimension_semantics=("parallel",),       # shard batch tiles over 2 TCs (v7x)
            vmem_limit_bytes=32 * 1024 * 1024,       # > v5e 16 MiB default, < v7x 64 MiB
        ),
    )(xp, w1, b1, w2, b2, w3, b3)
    return out[:batch, :OUT_F]


def reference_forward(x, params):
    # Pure-JAX reference with the original (unpadded) +/-1 parameters.
    # x is quantized to bf16 exactly like the kernel's input stream.
    w1, b1, w2, b2, w3, b3 = params
    x2d = x.reshape(-1, IN_F).astype(jnp.bfloat16).astype(jnp.float32)
    hp = jax.lax.Precision.HIGHEST
    h1 = jnp.maximum(jnp.dot(x2d, w1, precision=hp) + b1, 0.0)
    h2 = jnp.maximum(jnp.dot(h1, w2, precision=hp) + b2, 0.0)
    logits = jnp.dot(h2, w3, precision=hp) + b3
    return jax.nn.softmax(logits, axis=-1)


if __name__ == "__main__":
    key = jax.random.PRNGKey(0)
    kx, kp = jax.random.split(key)
    # small batch of MNIST-shaped inputs, NCHW like the PyTorch module expects
    x = 0.05 * jax.random.normal(kx, (8, 1, 28, 28), jnp.float32)
    params = make_params(kp)
    padded = pad_params(params)

    out = binary_net_forward(x, padded)
    out = jax.block_until_ready(out)

    ref = reference_forward(x, params)
    assert out.shape == (8, OUT_F)
    # bf16 input stream + approx reciprocal in the softmax -> ~1e-2 tolerance
    assert jnp.allclose(out, ref, atol=2e-2, rtol=2e-2), float(jnp.max(jnp.abs(out - ref)))
    assert jnp.allclose(jnp.sum(out, axis=-1), 1.0, atol=2e-2)
    print("KERNEL_OK")
</pallas_src>

<mosaic_0001>
module attributes {stable_mosaic.version = 11 : i64} {
  func.func @binary_net_kernel(%arg0: i32, %arg1: memref<16x896xbf16, #tpu.memory_space<vmem>>, %arg2: memref<896x256xbf16, #tpu.memory_space<vmem>>, %arg3: memref<1x256xf32, #tpu.memory_space<vmem>>, %arg4: memref<256x128xf32, #tpu.memory_space<vmem>>, %arg5: memref<1x128xf32, #tpu.memory_space<vmem>>, %arg6: memref<128x128xf32, #tpu.memory_space<vmem>>, %arg7: memref<1x128xf32, #tpu.memory_space<vmem>>, %arg8: memref<16x128xf32, #tpu.memory_space<vmem>>) attributes {dimension_semantics = [#tpu.dimension_semantics<parallel>], iteration_bounds = array<i64: 1>, scalar_prefetch = 0 : i64, scratch_operands = 0 : i64, tpu.core_type = #tpu.core_type<tc>, window_params = [{transform_indices = @transform_0, window_bounds = array<i64: 16, 896>}, {pipeline_mode = #tpu.pipeline_mode<synchronous>, transform_indices = @transform_1, window_bounds = array<i64: 896, 256>}, {pipeline_mode = #tpu.pipeline_mode<synchronous>, transform_indices = @transform_2, window_bounds = array<i64: 1, 256>}, {pipeline_mode = #tpu.pipeline_mode<synchronous>, transform_indices = @transform_3, window_bounds = array<i64: 256, 128>}, {pipeline_mode = #tpu.pipeline_mode<synchronous>, transform_indices = @transform_4, window_bounds = array<i64: 1, 128>}, {pipeline_mode = #tpu.pipeline_mode<synchronous>, transform_indices = @transform_5, window_bounds = array<i64: 128, 128>}, {pipeline_mode = #tpu.pipeline_mode<synchronous>, transform_indices = @transform_6, window_bounds = array<i64: 1, 128>}, {transform_indices = @transform_7, window_bounds = array<i64: 16, 128>}]} {
    %c0 = arith.constant 0 : index
    %c0_0 = arith.constant 0 : index
    %0 = vector.load %arg1[%c0, %c0_0] : memref<16x896xbf16, #tpu.memory_space<vmem>>, vector<16x896xbf16>
    %c0_1 = arith.constant 0 : index
    %c0_2 = arith.constant 0 : index
    %1 = vector.load %arg2[%c0_1, %c0_2] : memref<896x256xbf16, #tpu.memory_space<vmem>>, vector<896x256xbf16>
    %cst = arith.constant dense<0.000000e+00> : vector<16x256xf32>
    %2 = tpu.matmul %0, %1, %cst {dimension_numbers = #tpu.dot_dimension_numbers<[1], [0], [0], [1], [0, 0, 1, 1], [], []>} : vector<16x896xbf16>, vector<896x256xbf16>, vector<16x256xf32> -> vector<16x256xf32>
    %c0_3 = arith.constant 0 : index
    %c0_4 = arith.constant 0 : index
    %3 = vector.load %arg3[%c0_3, %c0_4] : memref<1x256xf32, #tpu.memory_space<vmem>>, vector<1x256xf32>
    %4 = vector.broadcast %3 : vector<1x256xf32> to vector<16x256xf32>
    %5 = arith.addf %2, %4 : vector<16x256xf32>
    %cst_5 = arith.constant 0.000000e+00 : f32
    %6 = vector.broadcast %cst_5 : f32 to vector<16x256xf32>
    %7 = arith.maximumf %5, %6 : vector<16x256xf32>
    %c0_6 = arith.constant 0 : index
    %c0_7 = arith.constant 0 : index
    %8 = vector.load %arg4[%c0_6, %c0_7] : memref<256x128xf32, #tpu.memory_space<vmem>>, vector<256x128xf32>
    %cst_8 = arith.constant dense<0.000000e+00> : vector<16x128xf32>
    %9 = tpu.matmul %7, %8, %cst_8 {dimension_numbers = #tpu.dot_dimension_numbers<[1], [0], [0], [1], [0, 0, 1, 1], [], []>} : vector<16x256xf32>, vector<256x128xf32>, vector<16x128xf32> -> vector<16x128xf32>
    %c0_9 = arith.constant 0 : index
    %c0_10 = arith.constant 0 : index
    %10 = vector.load %arg5[%c0_9, %c0_10] : memref<1x128xf32, #tpu.memory_space<vmem>>, vector<1x128xf32>
    %11 = vector.broadcast %10 : vector<1x128xf32> to vector<16x128xf32>
    %12 = arith.addf %9, %11 : vector<16x128xf32>
    %cst_11 = arith.constant 0.000000e+00 : f32
    %13 = vector.broadcast %cst_11 : f32 to vector<16x128xf32>
    %14 = arith.maximumf %12, %13 : vector<16x128xf32>
    %c0_12 = arith.constant 0 : index
    %c0_13 = arith.constant 0 : index
    %15 = vector.load %arg6[%c0_12, %c0_13] : memref<128x128xf32, #tpu.memory_space<vmem>>, vector<128x128xf32>
    %cst_14 = arith.constant dense<0.000000e+00> : vector<16x128xf32>
    %16 = tpu.matmul %14, %15, %cst_14 {dimension_numbers = #tpu.dot_dimension_numbers<[1], [0], [0], [1], [0, 0, 1, 1], [], []>} : vector<16x128xf32>, vector<128x128xf32>, vector<16x128xf32> -> vector<16x128xf32>
    %c0_15 = arith.constant 0 : index
    %c0_16 = arith.constant 0 : index
    %17 = vector.load %arg7[%c0_15, %c0_16] : memref<1x128xf32, #tpu.memory_space<vmem>>, vector<1x128xf32>
    %18 = vector.broadcast %17 : vector<1x128xf32> to vector<16x128xf32>
    %19 = arith.addf %16, %18 : vector<16x128xf32>
    %cst_17 = arith.constant dense<0xFF800000> : vector<16xf32>
    %20 = vector.multi_reduction <maximumf>, %19, %cst_17 [1] : vector<16x128xf32> to vector<16xf32>
    %21 = vector.shape_cast %20 : vector<16xf32> to vector<16x1xf32>
    %22 = vector.broadcast %21 : vector<16x1xf32> to vector<16x128xf32>
    %23 = arith.subf %19, %22 : vector<16x128xf32>
    %24 = math.exp %23 : vector<16x128xf32>
    %cst_18 = arith.constant dense<0.000000e+00> : vector<16xf32>
    %25 = vector.multi_reduction <add>, %24, %cst_18 [1] : vector<16x128xf32> to vector<16xf32>
    %26 = vector.shape_cast %25 : vector<16xf32> to vector<16x1xf32>
    %27 = tpu.reciprocal %26 {approx = true} : vector<16x1xf32> -> vector<16x1xf32>
    %28 = vector.broadcast %27 : vector<16x1xf32> to vector<16x128xf32>
    %29 = arith.mulf %24, %28 : vector<16x128xf32>
    %c0_19 = arith.constant 0 : index
    %c0_20 = arith.constant 0 : index
    %30 = vector.load %arg8[%c0_19, %c0_20] : memref<16x128xf32, #tpu.memory_space<vmem>>, vector<16x128xf32>
    tpu.vector_store %arg8[%c0_19, %c0_20], %29 {strides = array<i32>} : memref<16x128xf32, #tpu.memory_space<vmem>>, vector<16x128xf32>,
    return
  }
  func.func @transform_0(%arg0: i32) -> (i32, i32) {
    %c0_i32 = arith.constant 0 : i32
    %c0_i32_0 = arith.constant 0 : i32
    return %arg0, %c0_i32 : i32, i32
  }
  func.func @transform_1(%arg0: i32) -> (i32, i32) {
    %c0_i32 = arith.constant 0 : i32
    %c0_i32_0 = arith.constant 0 : i32
    %c0_i32_1 = arith.constant 0 : i32
    return %c0_i32, %c0_i32_0 : i32, i32
  }
  func.func @transform_2(%arg0: i32) -> (i32, i32) {
    %c0_i32 = arith.constant 0 : i32
    %c0_i32_0 = arith.constant 0 : i32
    %c0_i32_1 = arith.constant 0 : i32
    return %c0_i32, %c0_i32_0 : i32, i32
  }
  func.func @transform_3(%arg0: i32) -> (i32, i32) {
    %c0_i32 = arith.constant 0 : i32
    %c0_i32_0 = arith.constant 0 : i32
    %c0_i32_1 = arith.constant 0 : i32
    return %c0_i32, %c0_i32_0 : i32, i32
  }
  func.func @transform_4(%arg0: i32) -> (i32, i32) {
    %c0_i32 = arith.constant 0 : i32
    %c0_i32_0 = arith.constant 0 : i32
    %c0_i32_1 = arith.constant 0 : i32
    return %c0_i32, %c0_i32_0 : i32, i32
  }
  func.func @transform_5(%arg0: i32) -> (i32, i32) {
    %c0_i32 = arith.constant 0 : i32
    %c0_i32_0 = arith.constant 0 : i32
    %c0_i32_1 = arith.constant 0 : i32
    return %c0_i32, %c0_i32_0 : i32, i32
  }
  func.func @transform_6(%arg0: i32) -> (i32, i32) {
    %c0_i32 = arith.constant 0 : i32
    %c0_i32_0 = arith.constant 0 : i32
    %c0_i32_1 = arith.constant 0 : i32
    return %c0_i32, %c0_i32_0 : i32, i32
  }
  func.func @transform_7(%arg0: i32) -> (i32, i32) {
    %c0_i32 = arith.constant 0 : i32
    %c0_i32_0 = arith.constant 0 : i32
    return %arg0, %c0_i32 : i32, i32
  }
}

</mosaic_0001>

<bundles_post_ra>
// kernel: tpu_custom_call.1
= control target key start
LH: loop header
LB: loop body
LE: loop exit
PB: predicated region body
PF: predicated region fallthrough
CT: control target
= control target key end

     0   :  { %12 = vsyncpa [#allocation3], 0  ;;  %s1842_s0 = inlined_call_operand.hbm [shape: bf16[16,896], index: 0, kind: input, shape index: {}]   ;;  %s1843_s1 = inlined_call_operand.hbm [shape: bf16[896,256], index: 1, kind: input, shape index: {}]   ;;  %s1844_s2 = inlined_call_operand.vmem [shape: f32[1,256], index: 2, kind: input, shape index: {}]   ;;  %s1845_s3 = inlined_call_operand.hbm [shape: f32[256,128], index: 3, kind: input, shape index: {}]   ;;  %s1846_s4 = inlined_call_operand.vmem [shape: f32[1,128], index: 4, kind: input, shape index: {}]   ;;  %s1847_s5 = inlined_call_operand.hbm [shape: f32[128,128], index: 5, kind: input, shape index: {}]   ;;  %s1848_s6 = inlined_call_operand.vmem [shape: f32[1,128], index: 6, kind: input, shape index: {}]   ;;  %s1849_s7 = inlined_call_operand.hbm [shape: f32[16,128], index: 7, kind: output, shape index: {}]  }
   0x1   :  { %13 = vsyncpa [#allocation6], 0 }
   0x2   :  { %14 = vsyncpa [#allocation9], 0 }
   0x3   :  { %15 = vsyncpa [#allocation4], 0  ;;  %s1756_s24 = smov [#allocation5]  }
   0x4   :  { %s33_s25 = sshll.u32 %s1756_s24, 4  ;;  %s34_s25 = int_to_ptr.vmem [resolvable:$true] %s33_s25 }
   0x5   :  { %s1656_s26 = scalar_lea.vmem %s34_s25, 14336  ;;  %p1661_p1 = scmp.lt.s32.totalorder %s34_s25, %s34_s25 }
   0x6   :  { %p1657_p0 = scmp.ne.s32.totalorder %s34_s25, %s1656_s26  ;;  %p1662_p2 = scmp.lt.s32.totalorder %s1656_s26, %s1656_s26 }
   0x8   :  { %p1663_p3 = por %p1662_p2, %p1661_p1 }
   0xa   :  { %p1664_p4 = pnand %p1663_p3, %p1657_p0 }
   0xc   :  { %1667 = shalt.err (!%p1664_p4)
}
   0xd   :  { %s1757_s27 = smov 128   ;;  %s1758_s28 = smov 8  }
   0xe   :  { %39 = dma.hbm_to_vmem [thread:$0]  %s1843_s1, 14336, %s34_s25, [#allocation6], %s1757_s27, %s1757_s27, %s1758_s28  }
   0xf   :  { %s1759_s8 = smov [#allocation2]  }
  0x10   :  { %s21_s9 = sshll.u32 %s1759_s8, 4  ;;  %s22_s9 = int_to_ptr.vmem [resolvable:$true] %s21_s9 }
  0x11   :  { %s1676_s10 = scalar_lea.vmem %s22_s9, 896  ;;  %p1681_p6 = scmp.lt.s32.totalorder %s22_s9, %s22_s9 }
  0x12   :  { %p1677_p5 = scmp.ne.s32.totalorder %s22_s9, %s1676_s10  ;;  %p1682_p7 = scmp.lt.s32.totalorder %s1676_s10, %s1676_s10 }
  0x14   :  { %p1683_p8 = por %p1682_p7, %p1681_p6 }
  0x16   :  { %p1684_p9 = pnand %p1683_p8, %p1677_p5 }
  0x18   :  { %1687 = shalt.err (!%p1684_p9)
}
  0x19   :  { %s1760_s11 = smov 448   ;;  %s1761_s12 = smov 28  }
  0x1a   :  { %27 = dma.hbm_to_vmem [thread:$0]  %s1842_s0, 896, %s22_s9, [#allocation3], %s1760_s11, %s1760_s11, %s1761_s12  }
  0x1b   :  { %s1762_s15 = smov [#allocation7]   ;;  %s1763_s17 = smov [#allocation8]  }
  0x1c   :  { %s47_s16 = sshll.u32 %s1762_s15, 4  ;;  %s61_s1 = sshll.u32 %s1763_s17, 4  ;;  %s48_s16 = int_to_ptr.vmem [resolvable:$true] %s47_s16  ;;  %s62_s1 = int_to_ptr.vmem [resolvable:$true] %s61_s1 }
  0x1d   :  { %s1696_s18 = scalar_lea.vmem %s48_s16, 4096  ;;  %p1701_p11 = scmp.lt.s32.totalorder %s48_s16, %s48_s16 }
  0x1e   :  { %p1697_p10 = scmp.ne.s32.totalorder %s48_s16, %s1696_s18  ;;  %p1702_p12 = scmp.lt.s32.totalorder %s1696_s18, %s1696_s18 }
  0x20   :  { %p1703_p13 = por %p1702_p12, %p1701_p11 }
  0x22   :  { %p1704_p0 = pnand %p1703_p13, %p1697_p10 }
  0x24   :  { %1707 = shalt.err (!%p1704_p0)
}
  0x25   :  { %53 = dma.hbm_to_vmem [thread:$0]  %s1845_s3, 4096, %s48_s16, [#allocation6], %s1757_s27, %s1757_s27, %s1758_s28  }
  0x26   :  { %s1716_s0 = scalar_lea.vmem %s62_s1, 2048  ;;  %p1721_p2 = scmp.lt.s32.totalorder %s62_s1, %s62_s1 }
  0x27   :  { %p1717_p1 = scmp.ne.s32.totalorder %s62_s1, %s1716_s0  ;;  %p1722_p3 = scmp.lt.s32.totalorder %s1716_s0, %s1716_s0 }
  0x29   :  { %p1723_p4 = por %p1722_p3, %p1721_p2 }
  0x2b   :  { %p1724_p5 = pnand %p1723_p4, %p1717_p1 }
  0x2d   :  { %1727 = shalt.err (!%p1724_p5)
}
  0x2e   :  { %67 = dma.hbm_to_vmem [thread:$0]  %s1847_s5, 2048, %s62_s1, [#allocation9], %s1757_s27, %s1757_s27, %s1758_s28  }
  0x2f   :  { %1748 = dma.done.wait [#allocation3], 896  }
  0x30   :  { %1749 = vsyncadd [#allocation3], 4294966400 }
  0x31   :  { %1750 = dma.done.wait [#allocation6], 18432  }
  0x32   :  { %1751 = vsyncadd [#allocation6], 4294948864 }
  0x33   :  { %1752 = dma.done.wait [#allocation9], 2048  }
  0x34   :  { %1753 = vsyncadd [#allocation9], 4294965248  ;;  %v1462_v0 = vld [vmem:[#allocation5 + $0x74] ss:$8 sps:$4 sm:$0xff]   ;;  %v1464_v1 = vld [vmem:[#allocation5 + $0x70] ss:$8 sps:$4 sm:$0xff]  }
  0x35   :  { %811 = vmatprep.subr.bf16.mxu0 %v1462_v0  ;;  %v1465_v2 = vld [vmem:[#allocation5 + $0x174] ss:$8 sps:$4 sm:$0xff]   ;;  %v1467_v3 = vld [vmem:[#allocation5 + $0x170] ss:$8 sps:$4 sm:$0xff]   ;;  %v1468_v4 = vld [vmem:[#allocation5 + $0x64] ss:$8 sps:$4 sm:$0xff]  }
  0x36   :  { %812 = vmatpush1.bf16.msra.mxu0 %v1464_v1  ;;  %v1470_v5 = vld [vmem:[#allocation5 + $0x60] ss:$8 sps:$4 sm:$0xff]   ;;  %854 = vmatprep.subr.bf16.mxu1 %v1465_v2  ;;  %v1471_v6 = vld [vmem:[#allocation5 + $0x164] ss:$8 sps:$4 sm:$0xff]   ;;  %v1474_v8 = vld [vmem:[#allocation5 + $0x54] ss:$8 sps:$4 sm:$0xff]  }
  0x37   :  { %855 = vmatpush1.bf16.msra.mxu1 %v1467_v3  ;;  %813 = vmatprep.subr.bf16.mxu0 %v1468_v4  ;;  %v1473_v7 = vld [vmem:[#allocation5 + $0x160] ss:$8 sps:$4 sm:$0xff]   ;;  %v1476_v9 = vld [vmem:[#allocation5 + $0x50] ss:$8 sps:$4 sm:$0xff]   ;;  %v1477_v10 = vld [vmem:[#allocation5 + $0x154] ss:$8 sps:$4 sm:$0xff]  }
  0x38   :  { %856 = vmatprep.subr.bf16.mxu1 %v1471_v6  ;;  %v1480_v11 = vld [vmem:[#allocation5 + $0x44] ss:$8 sps:$4 sm:$0xff]   ;;  %v1479_v12 = vld [vmem:[#allocation5 + $0x150] ss:$8 sps:$4 sm:$0xff]   ;;  %v1482_v14 = vld [vmem:[#allocation5 + $0x40] ss:$8 sps:$4 sm:$0xff]  }
  0x39   :  { %v1483_v13 = vld [vmem:[#allocation5 + $0x144] ss:$8 sps:$4 sm:$0xff]   ;;  %v1486_v15 = vld [vmem:[#allocation5 + $0x34] ss:$8 sps:$4 sm:$0xff]   ;;  %v1485_v16 = vld [vmem:[#allocation5 + $0x140] ss:$8 sps:$4 sm:$0xff]  }
  0x3a   :  { %814 = vmatpush1.bf16.msra.mxu0 %v1470_v5  ;;  %v1489_v17 = vld [vmem:[#allocation5 + $0x134] ss:$8 sps:$4 sm:$0xff]   ;;  %v1488_v18 = vld [vmem:[#allocation5 + $0x30] ss:$8 sps:$4 sm:$0xff]   ;;  %v1492_v19 = vld [vmem:[#allocation5 + $0x24] ss:$8 sps:$4 sm:$0xff]  }
  0x3b   :  { %815 = vmatprep.subr.bf16.mxu0 %v1474_v8  ;;  %857 = vmatpush1.bf16.msra.mxu1 %v1473_v7  ;;  %v1491_v20 = vld [vmem:[#allocation5 + $0x130] ss:$8 sps:$4 sm:$0xff]   ;;  %v1495_v21 = vld [vmem:[#allocation5 + $0x124] ss:$8 sps:$4 sm:$0xff]   ;;  %v1494_v22 = vld [vmem:[#allocation5 + $0x20] ss:$8 sps:$4 sm:$0xff]  }
  0x3c   :  { %858 = vmatprep.subr.bf16.mxu1 %v1477_v10  ;;  %v1498_v23 = vld [vmem:[#allocation5 + $0x14] ss:$8 sps:$4 sm:$0xff]   ;;  %v1497_v24 = vld [vmem:[#allocation5 + $0x120] ss:$8 sps:$4 sm:$0xff]   ;;  %v1500_v26 = vld [vmem:[#allocation5 + $0x10] ss:$8 sps:$4 sm:$0xff]  }
  0x3d   :  { %v1501_v25 = vld [vmem:[#allocation5 + $0x114] ss:$8 sps:$4 sm:$0xff]   ;;  %v1504_v27 = vld [vmem:[#allocation5 + $0x4] ss:$8 sps:$4 sm:$0xff]   ;;  %v1503_v28 = vld [vmem:[#allocation5 + $0x110] ss:$8 sps:$4 sm:$0xff]  }
  0x3e   :  { %816 = vmatpush1.bf16.msra.mxu0 %v1476_v9  ;;  %v1507_v29 = vld [vmem:[#allocation5 + $0x104] ss:$8 sps:$4 sm:$0xff]   ;;  %v1506_v30 = vld [vmem:[#allocation5] ss:$8 sps:$4 sm:$0xff]   ;;  %v1510_v31 = vld [vmem:[#allocation5 + $0xf4] ss:$8 sps:$4 sm:$0xff]  }
  0x3f   :  { %817 = vmatprep.subr.bf16.mxu0 %v1480_v11  ;;  %859 = vmatpush1.bf16.msra.mxu1 %v1479_v12  ;;  %v1509_v32 = vld [vmem:[#allocation5 + $0x100] ss:$8 sps:$4 sm:$0xff]   ;;  %v1513_v33 = vld [vmem:[#allocation5 + $0x1f4] ss:$8 sps:$4 sm:$0xff]   ;;  %v1512_v34 = vld [vmem:[#allocation5 + $0xf0] ss:$8 sps:$4 sm:$0xff]  }
  0x40   :  { %860 = vmatprep.subr.bf16.mxu1 %v1483_v13  ;;  %v1516_v35 = vld [vmem:[#allocation5 + $0xe4] ss:$8 sps:$4 sm:$0xff]   ;;  %v1515_v36 = vld [vmem:[#allocation5 + $0x1f0] ss:$8 sps:$4 sm:$0xff]   ;;  %v1518_v38 = vld [vmem:[#allocation5 + $0xe0] ss:$8 sps:$4 sm:$0xff]  }
  0x41   :  { %v1519_v37 = vld [vmem:[#allocation5 + $0x1e4] ss:$8 sps:$4 sm:$0xff]   ;;  %v1522_v39 = vld [vmem:[#allocation5 + $0xd4] ss:$8 sps:$4 sm:$0xff]   ;;  %v1521_v40 = vld [vmem:[#allocation5 + $0x1e0] ss:$8 sps:$4 sm:$0xff]  }
  0x42   :  { %818 = vmatpush1.bf16.msra.mxu0 %v1482_v14  ;;  %v1525_v41 = vld [vmem:[#allocation5 + $0x1d4] ss:$8 sps:$4 sm:$0xff]   ;;  %v1524_v42 = vld [vmem:[#allocation5 + $0xd0] ss:$8 sps:$4 sm:$0xff]   ;;  %v1528_v43 = vld [vmem:[#allocation5 + $0xc4] ss:$8 sps:$4 sm:$0xff]  }
  0x43   :  { %819 = vmatprep.subr.bf16.mxu0 %v1486_v15  ;;  %861 = vmatpush1.bf16.msra.mxu1 %v1485_v16  ;;  %v1527_v44 = vld [vmem:[#allocation5 + $0x1d0] ss:$8 sps:$4 sm:$0xff]   ;;  %v1531_v45 = vld [vmem:[#allocation5 + $0x1c4] ss:$8 sps:$4 sm:$0xff]   ;;  %v1530_v46 = vld [vmem:[#allocation5 + $0xc0] ss:$8 sps:$4 sm:$0xff]  }
  0x44   :  { %862 = vmatprep.subr.bf16.mxu1 %v1489_v17  ;;  %v1559_v47 = vld [vmem:[#allocation2 + $0x4] ss:$28 sps:$4 sm:$0xff]   ;;  %v1534_v48 = vld [vmem:[#allocation5 + $0xb4] ss:$8 sps:$4 sm:$0xff]   ;;  %v1536_v52 = vld [vmem:[#allocation5 + $0xb0] ss:$8 sps:$4 sm:$0xff]  }
  0x45   :  { %v1533_v49 = vld [vmem:[#allocation5 + $0x1c0] ss:$8 sps:$4 sm:$0xff]   ;;  %843 = vmatprep.mubr.bf16.mxu0 %v1559_v47  ;;  %v1537_v50 = vld [vmem:[#allocation5 + $0x1b4] ss:$8 sps:$4 sm:$0xff]   ;;  %v1540_v53 = vld [vmem:[#allocation5 + $0xa4] ss:$8 sps:$4 sm:$0xff]  }
  0x46   :  { %820 = vmatpush1.bf16.msra.mxu0 %v1488_v18  ;;  %v1566_v51 = vld [vmem:[#allocation2 + $0xc] ss:$28 sps:$4 sm:$0xff]   ;;  %v1543_v55 = vld [vmem:[#allocation5 + $0x1a4] ss:$8 sps:$4 sm:$0xff]   ;;  %v1542_v56 = vld [vmem:[#allocation5 + $0xa0] ss:$8 sps:$4 sm:$0xff]  }
  0x47   :  { %821 = vmatprep.subr.bf16.mxu0 %v1492_v19  ;;  %863 = vmatpush1.bf16.msra.mxu1 %v1491_v20  ;;  %v1539_v54 = vld [vmem:[#allocation5 + $0x1b0] ss:$8 sps:$4 sm:$0xff]   ;;  %v1546_v57 = vld [vmem:[#allocation5 + $0x94] ss:$8 sps:$4 sm:$0xff]   ;;  %v1545_v58 = vld [vmem:[#allocation5 + $0x1a0] ss:$8 sps:$4 sm:$0xff]  }
  0x48   :  { %864 = vmatprep.subr.bf16.mxu1 %v1495_v21  ;;  %886 = vmatprep.mubr.bf16.mxu1 %v1566_v51  ;;  %v1549_v59 = vld [vmem:[#allocation5 + $0x194] ss:$8 sps:$4 sm:$0xff]   ;;  %v1548_v60 = vld [vmem:[#allocation5 + $0x90] ss:$8 sps:$4 sm:$0xff]   ;;  %v1552_v61 = vld [vmem:[#allocation5 + $0x84] ss:$8 sps:$4 sm:$0xff]  }
  0x49   :  { %v1551_v62 = vld [vmem:[#allocation5 + $0x190] ss:$8 sps:$4 sm:$0xff]   ;;  %v1555_v63 = vld [vmem:[#allocation5 + $0x184] ss:$8 sps:$4 sm:$0xff]   ;;  %v1554_v0 = vld [vmem:[#allocation5 + $0x80] ss:$8 sps:$4 sm:$0xff]  }
  0x4a   :  { %822 = vmatpush1.bf16.msra.mxu0 %v1494_v22  ;;  %v1563_v1 = vld [vmem:[#allocation5 + $0x274] ss:$8 sps:$4 sm:$0xff]   ;;  %v1560_v2 = vld [vmem:[#allocation5 + $0x180] ss:$8 sps:$4 sm:$0xff]   ;;  %v1561_v5 = vld [vmem:[#allocation5 + $0x270] ss:$8 sps:$4 sm:$0xff]  }
  0x4b   :  { %823 = vmatprep.subr.bf16.mxu0 %v1498_v23  ;;  %865 = vmatpush1.bf16.msra.mxu1 %v1497_v24  ;;  %v1557_v3 = vld [vmem:[#allocation2] ss:$28 sps:$4 sm:$0xff]   ;;  %v1590_v4 = vld [vmem:[#allocation5 + $0x374] ss:$8 sps:$4 sm:$0xff]   ;;  %v1564_v6 = vld [vmem:[#allocation2 + $0x8] ss:$28 sps:$4 sm:$0xff]  }
  0x4c   :  { %866 = vmatprep.subr.bf16.mxu1 %v1501_v25  ;;  %v1569_v7 = vld [vmem:[#allocation5 + $0x264] ss:$8 sps:$4 sm:$0xff]   ;;  %v1588_v8 = vld [vmem:[#allocation5 + $0x370] ss:$8 sps:$4 sm:$0xff]   ;;  %v1567_v10 = vld [vmem:[#allocation5 + $0x260] ss:$8 sps:$4 sm:$0xff]  }
  0x4d   :  { %v1596_v9 = vld [vmem:[#allocation5 + $0x364] ss:$8 sps:$4 sm:$0xff]   ;;  %v1572_v11 = vld [vmem:[#allocation5 + $0x254] ss:$8 sps:$4 sm:$0xff]   ;;  %v1594_v12 = vld [vmem:[#allocation5 + $0x360] ss:$8 sps:$4 sm:$0xff]  }
  0x4e   :  { %824 = vmatpush1.bf16.msra.mxu0 %v1500_v26  ;;  %v1764_v13 = vmov 0   ;;  %v1602_v14 = vld [vmem:[#allocation5 + $0x354] ss:$8 sps:$4 sm:$0xff]   ;;  %v1570_v15 = vld [vmem:[#allocation5 + $0x250] ss:$8 sps:$4 sm:$0xff]  }
  0x4f   :  { %825 = vmatprep.subr.bf16.mxu0 %v1504_v27  ;;  %867 = vmatpush1.bf16.msra.mxu1 %v1503_v28  ;;  %v1575_v16 = vld [vmem:[#allocation5 + $0x244] ss:$8 sps:$4 sm:$0xff]   ;;  %v1600_v17 = vld [vmem:[#allocation5 + $0x350] ss:$8 sps:$4 sm:$0xff]   ;;  %v1573_v19 = vld [vmem:[#allocation5 + $0x240] ss:$8 sps:$4 sm:$0xff]  }
  0x50   :  { %868 = vmatprep.subr.bf16.mxu1 %v1507_v29  ;;  %v1608_v18 = vld [vmem:[#allocation5 + $0x344] ss:$8 sps:$4 sm:$0xff]   ;;  %v1578_v20 = vld [vmem:[#allocation5 + $0x234] ss:$8 sps:$4 sm:$0xff]   ;;  %v1606_v21 = vld [vmem:[#allocation5 + $0x340] ss:$8 sps:$4 sm:$0xff]  }
  0x51   :  { %v1614_v22 = vld [vmem:[#allocation5 + $0x334] ss:$8 sps:$4 sm:$0xff]   ;;  %v1576_v23 = vld [vmem:[#allocation5 + $0x230] ss:$8 sps:$4 sm:$0xff]   ;;  %v1581_v25 = vld [vmem:[#allocation5 + $0x224] ss:$8 sps:$4 sm:$0xff]  }
  0x52   :  { %826 = vmatpush1.bf16.msra.mxu0 %v1506_v30  ;;  %v1639_v24 = vld [vmem:[#allocation2 + $0x14] ss:$28 sps:$4 sm:$0xff]   ;;  %v1620_v27 = vld [vmem:[#allocation5 + $0x324] ss:$8 sps:$4 sm:$0xff]   ;;  %v1579_v28 = vld [vmem:[#allocation5 + $0x220] ss:$8 sps:$4 sm:$0xff]  }
  0x53   :  { %827 = vmatprep.subr.bf16.mxu0 %v1510_v31  ;;  %869 = vmatpush1.bf16.msra.mxu1 %v1509_v32  ;;  %v1612_v26 = vld [vmem:[#allocation5 + $0x330] ss:$8 sps:$4 sm:$0xff]   ;;  %v1584_v29 = vld [vmem:[#allocation5 + $0x214] ss:$8 sps:$4 sm:$0xff]   ;;  %v1618_v30 = vld [vmem:[#allocation5 + $0x320] ss:$8 sps:$4 sm:$0xff]  }
  0x54   :  { %870 = vmatprep.subr.bf16.mxu1 %v1513_v33  ;;  %v1626_v31 = vld [vmem:[#allocation5 + $0x314] ss:$8 sps:$4 sm:$0xff]   ;;  %v1582_v32 = vld [vmem:[#allocation5 + $0x210] ss:$8 sps:$4 sm:$0xff]   ;;  %v1587_v33 = vld [vmem:[#allocation5 + $0x204] ss:$8 sps:$4 sm:$0xff]  }
  0x55   :  { %v1617_v47 = vld [vmem:[#allocation5 + $0x2b4] ss:$8 sps:$4 sm:$0xff]  }
  0x56   :  { %828 = vmatpush2.bf16.msra.mxu0 %v1512_v34  ;;  %v1624_v34 = vld [vmem:[#allocation5 + $0x310] ss:$8 sps:$4 sm:$0xff]   ;;  %v1629_v51 = vld [vmem:[#allocation5 + $0x294] ss:$8 sps:$4 sm:$0xff]  }
  0x57   :  { %829 = vmatprep.subr.bf16.mxu0 %v1516_v35  ;;  %871 = vmatpush2.bf16.msra.mxu1 %v1515_v36  ;;  %v1632_v35 = vld [vmem:[#allocation5 + $0x304] ss:$8 sps:$4 sm:$0xff]   ;;  %v1585_v36 = vld [vmem:[#allocation5 + $0x200] ss:$8 sps:$4 sm:$0xff]  }
  0x58   :  { %872 = vmatprep.subr.bf16.mxu1 %v1519_v37  ;;  %v1593_v37 = vld [vmem:[#allocation5 + $0x2f4] ss:$8 sps:$4 sm:$0xff]  }
  0x5a   :  { %830 = vmatpush2.bf16.msra.mxu0 %v1518_v38  ;;  %v1630_v38 = vld [vmem:[#allocation5 + $0x300] ss:$8 sps:$4 sm:$0xff]  }
  0x5b   :  { %831 = vmatprep.subr.bf16.mxu0 %v1522_v39  ;;  %873 = vmatpush2.bf16.msra.mxu1 %v1521_v40  ;;  %v1591_v39 = vld [vmem:[#allocation5 + $0x2f0] ss:$8 sps:$4 sm:$0xff]   ;;  %v1599_v40 = vld [vmem:[#allocation5 + $0x2e4] ss:$8 sps:$4 sm:$0xff]  }
  0x5c   :  { %874 = vmatprep.subr.bf16.mxu1 %v1525_v41  ;;  %v1636_v41 = vld [vmem:[#allocation2 + $0x18] ss:$28 sps:$4 sm:$0xff]  }
  0x5e   :  { %832 = vmatpush2.bf16.msra.mxu0 %v1524_v42  ;;  %v1597_v42 = vld [vmem:[#allocation5 + $0x2e0] ss:$8 sps:$4 sm:$0xff]  }
  0x5f   :  { %833 = vmatprep.subr.bf16.mxu0 %v1528_v43  ;;  %875 = vmatpush2.bf16.msra.mxu1 %v1527_v44  ;;  %v1605_v43 = vld [vmem:[#allocation5 + $0x2d4] ss:$8 sps:$4 sm:$0xff]   ;;  %v1603_v44 = vld [vmem:[#allocation5 + $0x2d0] ss:$8 sps:$4 sm:$0xff]  }
  0x60   :  { %876 = vmatprep.subr.bf16.mxu1 %v1531_v45  ;;  %v1611_v45 = vld [vmem:[#allocation5 + $0x2c4] ss:$8 sps:$4 sm:$0xff]  }
  0x62   :  { %834 = vmatpush2.bf16.msra.mxu0 %v1530_v46  ;;  %v1609_v46 = vld [vmem:[#allocation5 + $0x2c0] ss:$8 sps:$4 sm:$0xff]  }
  0x63   :  { %835 = vmatprep.subr.bf16.mxu0 %v1534_v48  ;;  %877 = vmatpush2.bf16.msra.mxu1 %v1533_v49  ;;  %v1615_v48 = vld [vmem:[#allocation5 + $0x2b0] ss:$8 sps:$4 sm:$0xff]   ;;  %v1623_v49 = vld [vmem:[#allocation5 + $0x2a4] ss:$8 sps:$4 sm:$0xff]  }
  0x64   :  { %878 = vmatprep.subr.bf16.mxu1 %v1537_v50  ;;  %v1621_v50 = vld [vmem:[#allocation5 + $0x2a0] ss:$8 sps:$4 sm:$0xff]  }
  0x66   :  { %836 = vmatpush2.bf16.msra.mxu0 %v1536_v52  ;;  %v1627_v52 = vld [vmem:[#allocation5 + $0x290] ss:$8 sps:$4 sm:$0xff]  }
  0x67   :  { %837 = vmatprep.subr.bf16.mxu0 %v1540_v53  ;;  %879 = vmatpush2.bf16.msra.mxu1 %v1539_v54  ;;  %v1635_v53 = vld [vmem:[#allocation5 + $0x284] ss:$8 sps:$4 sm:$0xff]   ;;  %v1633_v54 = vld [vmem:[#allocation5 + $0x280] ss:$8 sps:$4 sm:$0xff]  }
  0x68   :  { %880 = vmatprep.subr.bf16.mxu1 %v1543_v55  ;;  %v1637_v55 = vld [vmem:[#allocation2 + $0x10] ss:$28 sps:$4 sm:$0xff]  }
  0x6a   :  { %838 = vmatpush2.bf16.msra.mxu0 %v1542_v56  ;;  %v1018_v56 = vld [vmem:[#allocation7 + $0xf8] sm:$0xff] }
  0x6b   :  { %839 = vmatprep.subr.bf16.mxu0 %v1546_v57  ;;  %881 = vmatpush2.bf16.msra.mxu1 %v1545_v58  ;;  %v1002_v57 = vld [vmem:[#allocation7 + $0x78] sm:$0xff]  ;;  %v1017_v58 = vld [vmem:[#allocation7 + $0xf0] sm:$0xff] }
  0x6c   :  { %882 = vmatprep.subr.bf16.mxu1 %v1549_v59  ;;  %v1001_v59 = vld [vmem:[#allocation7 + $0x70] sm:$0xff] }
  0x6e   :  { %840 = vmatpush2.bf16.msra.mxu0 %v1548_v60  ;;  %v1016_v60 = vld [vmem:[#allocation7 + $0xe8] sm:$0xff] }
  0x6f   :  { %841 = vmatprep.subr.bf16.mxu0 %v1552_v61  ;;  %883 = vmatpush2.bf16.msra.mxu1 %v1551_v62  ;;  %v1000_v61 = vld [vmem:[#allocation7 + $0x68] sm:$0xff]  ;;  %v1015_v62 = vld [vmem:[#allocation7 + $0xe0] sm:$0xff] }
  0x70   :  { %884 = vmatprep.subr.bf16.mxu1 %v1555_v63  ;;  %v999_v63 = vld [vmem:[#allocation7 + $0x60] sm:$0xff] }
  0x72   :  { %842 = vmatpush2.bf16.msra.mxu0 %v1554_v0  ;;  %v1014_v0 = vld [vmem:[#allocation7 + $0xd8] sm:$0xff] }
  0x73   :  { %897 = vmatprep.subr.bf16.mxu0 %v1563_v1  ;;  %885 = vmatpush2.bf16.msra.mxu1 %v1560_v2  ;;  %v998_v1 = vld [vmem:[#allocation7 + $0x58] sm:$0xff]  ;;  %v1013_v2 = vld [vmem:[#allocation7 + $0xd0] sm:$0xff] }
  0x74   :  { %940 = vmatprep.subr.bf16.mxu1 %v1590_v4  ;;  %v1012_v4 = vld [vmem:[#allocation7 + $0xc8] sm:$0xff] }
  0x75   :  { %844 = vmatmul.mubr.bf16.vlgmr.msra.gmra.mxu0 %v1557_v3  ;;  %v997_v3 = vld [vmem:[#allocation7 + $0x50] sm:$0xff] }
  0x76   :  { %898 = vmatpush1.bf16.msra.mxu0 %v1561_v5  ;;  %887 = vmatmul.mubr.bf16.vlgmr.msra.gmra.mxu1 %v1564_v6  ;;  %v996_v5 = vld [vmem:[#allocation7 + $0x48] sm:$0xff]  ;;  %v1011_v6 = vld [vmem:[#allocation7 + $0xc0] sm:$0xff] }
  0x77   :  { %899 = vmatprep.subr.bf16.mxu0 %v1569_v7  ;;  %941 = vmatpush1.bf16.msra.mxu1 %v1588_v8  ;;  %v995_v7 = vld [vmem:[#allocation7 + $0x40] sm:$0xff]  ;;  %v1010_v8 = vld [vmem:[#allocation7 + $0xb8] sm:$0xff] }
  0x78   :  { %972 = vmatprep.mubr.bf16.mxu1 %v1764_v13  ;;  %942 = vmatprep.subr.bf16.mxu1 %v1596_v9  ;;  %v994_v9 = vld [vmem:[#allocation7 + $0x38] sm:$0xff]  ;;  %v992_v13 = vld [vmem:[#allocation7 + $0x28] sm:$0xff] }
  0x79   :  { %929 = vmatprep.mubr.bf16.mxu0 %v1639_v24  ;;  %v1118_v24 = vld [vmem:[#allocation8 + $0x78] sm:$0xff] }
  0x7a   :  { %900 = vmatpush1.bf16.msra.mxu0 %v1567_v10  ;;  %v1009_v10 = vld [vmem:[#allocation7 + $0xb0] sm:$0xff] }
  0x7b   :  { %901 = vmatprep.subr.bf16.mxu0 %v1572_v11  ;;  %943 = vmatpush1.bf16.msra.mxu1 %v1594_v12  ;;  %v993_v11 = vld [vmem:[#allocation7 + $0x30] sm:$0xff]  ;;  %v1008_v12 = vld [vmem:[#allocation7 + $0xa8] sm:$0xff] }
  0x7c   :  { %944 = vmatprep.subr.bf16.mxu1 %v1602_v14  ;;  %v1007_v14 = vld [vmem:[#allocation7 + $0xa0] sm:$0xff] }
  0x7e   :  { %902 = vmatpush1.bf16.msra.mxu0 %v1570_v15  ;;  %v991_v15 = vld [vmem:[#allocation7 + $0x20] sm:$0xff] }
  0x7f   :  { %903 = vmatprep.subr.bf16.mxu0 %v1575_v16  ;;  %945 = vmatpush1.bf16.msra.mxu1 %v1600_v17  ;;  %v1006_v16 = vld [vmem:[#allocation7 + $0x98] sm:$0xff] }
  0x80   :  { %946 = vmatprep.subr.bf16.mxu1 %v1608_v18  ;;  %v990_v17 = vld [vmem:[#allocation7 + $0x18] sm:$0xff]  ;;  %v1005_v18 = vld [vmem:[#allocation7 + $0x90] sm:$0xff] }
  0x82   :  { %904 = vmatpush1.bf16.msra.mxu0 %v1573_v19  ;;  %v989_v19 = vld [vmem:[#allocation7 + $0x10] sm:$0xff] }
  0x83   :  { %905 = vmatprep.subr.bf16.mxu0 %v1578_v20  ;;  %947 = vmatpush1.bf16.msra.mxu1 %v1606_v21  ;;  %v1004_v20 = vld [vmem:[#allocation7 + $0x88] sm:$0xff] }
  0x84   :  { %948 = vmatprep.subr.bf16.mxu1 %v1614_v22  ;;  %v988_v21 = vld [vmem:[#allocation7 + $0x8] sm:$0xff]  ;;  %v1003_v22 = vld [vmem:[#allocation7 + $0x80] sm:$0xff] }
  0x86   :  { %906 = vmatpush1.bf16.msra.mxu0 %v1576_v23  ;;  %v987_v23 = vld [vmem:[#allocation7] sm:$0xff] }
  0x87   :  { %907 = vmatprep.subr.bf16.mxu0 %v1581_v25  ;;  %949 = vmatpush1.bf16.msra.mxu1 %v1612_v26  ;;  %v1117_v25 = vld [vmem:[#allocation8 + $0x70] sm:$0xff]  ;;  %v1116_v26 = vld [vmem:[#allocation8 + $0x68] sm:$0xff] }
  0x88   :  { %950 = vmatprep.subr.bf16.mxu1 %v1620_v27  ;;  %v1115_v27 = vld [vmem:[#allocation8 + $0x60] sm:$0xff] }
  0x8a   :  { %908 = vmatpush1.bf16.msra.mxu0 %v1579_v28  ;;  %v1114_v28 = vld [vmem:[#allocation8 + $0x58] sm:$0xff] }
  0x8b   :  { %909 = vmatprep.subr.bf16.mxu0 %v1584_v29  ;;  %951 = vmatpush1.bf16.msra.mxu1 %v1618_v30  ;;  %v1113_v29 = vld [vmem:[#allocation8 + $0x50] sm:$0xff]  ;;  %v1112_v30 = vld [vmem:[#allocation8 + $0x48] sm:$0xff] }
  0x8c   :  { %952 = vmatprep.subr.bf16.mxu1 %v1626_v31  ;;  %v1111_v31 = vld [vmem:[#allocation8 + $0x40] sm:$0xff] }
  0x8e   :  { %910 = vmatpush1.bf16.msra.mxu0 %v1582_v32  ;;  %v1110_v32 = vld [vmem:[#allocation8 + $0x38] sm:$0xff] }
  0x8f   :  { %911 = vmatprep.subr.bf16.mxu0 %v1587_v33  ;;  %953 = vmatpush1.bf16.msra.mxu1 %v1624_v34  ;;  %v1109_v33 = vld [vmem:[#allocation8 + $0x30] sm:$0xff]  ;;  %v205_v34 = vlaneseq }
  0x90   :  { %954 = vmatprep.subr.bf16.mxu1 %v1632_v35 }
  0x92   :  { %912 = vmatpush1.bf16.msra.mxu0 %v1585_v36  ;;  %v206_v36 = vshrl.u32 %v205_v34, 7 }
  0x93   :  { %913 = vmatprep.subr.bf16.mxu0 %v1593_v37  ;;  %955 = vmatpush1.bf16.msra.mxu1 %v1630_v38 }
  0x94   :  { %1361 = vmatprep.subr.mxu1 %v1018_v56 }
  0x96   :  { %914 = vmatpush2.bf16.msra.mxu0 %v1591_v39  ;;  %973 = vmatmul.mubr.bf16.vlgmr.msra.gmra.mxu1 %v1636_v41  ;;  %v207_v39 = vsub.s32 0, %v206_v36  ;;  %v211_v41 = vsub.s32 1, %v206_v36 }
  0x97   :  { %915 = vmatprep.subr.bf16.mxu0 %v1599_v40  ;;  %1362 = vmatpush3.msra.mxu1 %v1002_v57  ;;  %v203_v40 = vld [vmem:[%s1844_s2] sm:$0x3] }
  0x98   :  { %1363 = vmatprep.subr.mxu1 %v1017_v58 }
  0x99   :  { %1364 = vmatpush3.msra.mxu1 %v1001_v59 }
  0x9a   :  { %916 = vmatpush2.bf16.msra.mxu0 %v1597_v42  ;;  %1365 = vmatprep.subr.mxu1 %v1016_v60 }
  0x9b   :  { %917 = vmatprep.subr.bf16.mxu0 %v1605_v43  ;;  %1366 = vmatpush3.msra.mxu1 %v1000_v61 }
  0x9c   :  { %1367 = vmatprep.subr.mxu1 %v1015_v62 }
  0x9d   :  { %1368 = vmatpush3.msra.mxu1 %v999_v63 }
  0x9e   :  { %918 = vmatpush2.bf16.msra.mxu0 %v1603_v44  ;;  %1369 = vmatprep.subr.mxu1 %v1014_v0  ;;  %v208_v44 = vrot.slane %v203_v40, %v207_v39 }
  0x9f   :  { %919 = vmatprep.subr.bf16.mxu0 %v1611_v45  ;;  %1370 = vmatpush3.msra.mxu1 %v998_v1  ;;  %v212_v45 = vrot.slane %v203_v40, %v211_v41 }
  0xa0   :  { %1371 = vmatprep.subr.mxu1 %v1013_v2 }
  0xa1   :  { %1372 = vmatpush3.msra.mxu1 %v997_v3 }
  0xa2   :  { %920 = vmatpush2.bf16.msra.mxu0 %v1609_v46  ;;  %1373 = vmatprep.subr.mxu1 %v1012_v4 }
  0xa3   :  { %921 = vmatprep.subr.bf16.mxu0 %v1617_v47  ;;  %1374 = vmatpush3.msra.mxu1 %v996_v5 }
  0xa4   :  { %1375 = vmatprep.subr.mxu1 %v1011_v6 }
  0xa5   :  { %1376 = vmatpush3.msra.mxu1 %v995_v7 }
  0xa6   :  { %922 = vmatpush2.bf16.msra.mxu0 %v1615_v48  ;;  %1377 = vmatprep.subr.mxu1 %v1010_v8 }
  0xa7   :  { %923 = vmatprep.subr.bf16.mxu0 %v1623_v49  ;;  %1378 = vmatpush3.msra.mxu1 %v994_v9 }
  0xa8   :  { %1379 = vmatprep.subr.mxu1 %v1009_v10 }
  0xa9   :  { %1380 = vmatpush3.msra.mxu1 %v993_v11 }
  0xaa   :  { %924 = vmatpush2.bf16.msra.mxu0 %v1621_v50  ;;  %1381 = vmatprep.subr.mxu1 %v1008_v12 }
  0xab   :  { %925 = vmatprep.subr.bf16.mxu0 %v1629_v51  ;;  %1382 = vmatpush3.msra.mxu1 %v992_v13  ;;  %v1108_v13 = vld [vmem:[#allocation8 + $0x28] sm:$0xff] }
  0xac   :  { %1383 = vmatprep.subr.mxu1 %v1007_v14  ;;  %v1107_v14 = vld [vmem:[#allocation8 + $0x20] sm:$0xff] }
  0xad   :  { %1384 = vmatpush3.msra.mxu1 %v991_v15  ;;  %v1106_v15 = vld [vmem:[#allocation8 + $0x18] sm:$0xff] }
  0xae   :  { %926 = vmatpush2.bf16.msra.mxu0 %v1627_v52  ;;  %1385 = vmatprep.subr.mxu1 %v1006_v16  ;;  %v1105_v16 = vld [vmem:[#allocation8 + $0x10] sm:$0xff] }
  0xaf   :  { %927 = vmatprep.subr.bf16.mxu0 %v1635_v53  ;;  %1386 = vmatpush3.msra.mxu1 %v990_v17  ;;  %v1104_v17 = vld [vmem:[#allocation8 + $0x8] sm:$0xff] }
  0xb0   :  { %1387 = vmatprep.subr.mxu1 %v1005_v18  ;;  %v1103_v18 = vld [vmem:[#allocation8] sm:$0xff] }
  0xb1   :  { %1388 = vmatpush3.msra.mxu1 %v989_v19 }
  0xb2   :  { %928 = vmatpush2.bf16.msra.mxu0 %v1633_v54  ;;  %1389 = vmatprep.subr.mxu1 %v1004_v20  ;;  %v1359_v20 = vld [vmem:[%s1846_s4] ss:$0 sm:$0xff]  ;;  %s1765_s4 = smov [#allocation10]  }
  0xb3   :  { %1390 = vmatpush3.msra.mxu1 %v988_v21  ;;  %1417 = vmatprep.subr.mxu0 %v1118_v24 }
  0xb4   :  { %1391 = vmatprep.subr.mxu1 %v1003_v22 }
  0xb5   :  { %930 = vmatmul.mubr.bf16.vlgmr.msra.gmra.mxu0 %v1637_v55  ;;  %1392 = vmatpush3.msra.mxu1 %v987_v23 }
  0xb6   :  { %1418 = vmatpush3.msra.mxu0 %v1118_v24 }
  0xb7   :  { %1419 = vmatprep.subr.mxu0 %v1117_v25 }
  0xb8   :  { %1420 = vmatpush3.msra.mxu0 %v1117_v25 }
  0xb9   :  { %1421 = vmatprep.subr.mxu0 %v1116_v26 }
  0xba   :  { %1422 = vmatpush3.msra.mxu0 %v1116_v26 }
  0xbb   :  { %1423 = vmatprep.subr.mxu0 %v1115_v27 }
  0xbc   :  { %1424 = vmatpush3.msra.mxu0 %v1115_v27 }
  0xbd   :  { %1425 = vmatprep.subr.mxu0 %v1114_v28 }
  0xbe   :  { %1426 = vmatpush3.msra.mxu0 %v1114_v28 }
  0xbf   :  { %1427 = vmatprep.subr.mxu0 %v1113_v29 }
  0xc0   :  { %1428 = vmatpush3.msra.mxu0 %v1113_v29 }
  0xc1   :  { %1429 = vmatprep.subr.mxu0 %v1112_v30 }
  0xc2   :  { %1430 = vmatpush3.msra.mxu0 %v1112_v30 }
  0xc3   :  { %1431 = vmatprep.subr.mxu0 %v1111_v31 }
  0xc4   :  { %1432 = vmatpush3.msra.mxu0 %v1111_v31  ;;  %v1360_v31 = vld [vmem:[%s1848_s6] ss:$0 sm:$0xff]  ;;  %s1226_s6 = sshll.u32 %s1765_s4, 4  ;;  %s1227_s6 = int_to_ptr.vmem [resolvable:$true] %s1226_s6 }
  0xc5   :  { %1433 = vmatprep.subr.mxu0 %v1110_v32  ;;  %s1728_s26 = scalar_lea.vmem %s1227_s6, 256  ;;  %p1733_p7 = scmp.lt.s32.totalorder %s1227_s6, %s1227_s6 }
  0xc6   :  { %1434 = vmatpush3.msra.mxu0 %v1110_v32  ;;  %p1729_p6 = scmp.ne.s32.totalorder %s1227_s6, %s1728_s26  ;;  %p1734_p8 = scmp.lt.s32.totalorder %s1728_s26, %s1728_s26 }
  0xc7   :  { %1435 = vmatprep.subr.mxu0 %v1109_v33 }
  0xc8   :  { %1436 = vmatpush3.msra.mxu0 %v1109_v33  ;;  %p1735_p9 = por %p1734_p8, %p1733_p7 }
  0xc9   :  { %1437 = vmatprep.subr.mxu0 %v1108_v13 }
  0xca   :  { %1438 = vmatpush3.msra.mxu0 %v1108_v13  ;;  %p1736_p10 = pnand %p1735_p9, %p1729_p6 }
  0xcb   :  { %1439 = vmatprep.subr.mxu0 %v1107_v14 }
  0xcc   :  { %1440 = vmatpush3.msra.mxu0 %v1107_v14 }
  0xcd   :  { %1441 = vmatprep.subr.mxu0 %v1106_v15 }
  0xce   :  { %1442 = vmatpush3.msra.mxu0 %v1106_v15 }
  0xcf   :  { %1443 = vmatprep.subr.mxu0 %v1105_v16 }
  0xd0   :  { %1444 = vmatpush3.msra.mxu0 %v1105_v16 }
  0xd1   :  { %1445 = vmatprep.subr.mxu0 %v1104_v17 }
  0xd2   :  { %1446 = vmatpush3.msra.mxu0 %v1104_v17 }
  0xd3   :  { %1447 = vmatprep.subr.mxu0 %v1103_v18 }
  0xd4   :  { %1448 = vmatpush3.msra.mxu0 %v1103_v18 }
 0x135   :  { %v845_v37 = vpop.f32.mrf.mxu0 }
 0x136   :  { %v888_v35 = vpop.f32.mrf.mxu1  ;;  %v846_v48 = vadd.f32 %v845_v37, %v208_v44 }
 0x137   :  { %v847_v42 = vpop.f32.mrf.mxu0 }
 0x138   :  { %v890_v38 = vpop.f32.mrf.mxu1  ;;  %v848_v50 = vadd.f32 %v847_v42, %v212_v45  ;;  %v889_v52 = vadd.f32 %v888_v35, %v846_v48 }
 0x139   :  { %v849_v46 = vpop.f32.mrf.mxu0 }
 0x13a   :  { %v892_v43 = vpop.f32.mrf.mxu1  ;;  %v850_v53 = vadd.f32 %v849_v46, %v208_v44  ;;  %v891_v56 = vadd.f32 %v890_v38, %v848_v50 }
 0x13b   :  { %v851_v51 = vpop.f32.mrf.mxu0 }
 0x13c   :  { %v894_v47 = vpop.f32.mrf.mxu1  ;;  %v852_v57 = vadd.f32 %v851_v51, %v212_v45  ;;  %v893_v60 = vadd.f32 %v892_v43, %v850_v53 }
 0x13e   :  { %v895_v1 = vadd.f32 %v894_v47, %v852_v57 }
 0x156   :  { %v974_v49 = vpop.f32.mrf.mxu1 }
 0x158   :  { %v976_v54 = vpop.f32.mrf.mxu1 }
 0x15a   :  { %v978_v63 = vpop.f32.mrf.mxu1 }
 0x15c   :  { %v980_v8 = vpop.f32.mrf.mxu1 }
 0x175   :  { %v931_v55 = vpop.f32.mrf.mxu0 }
 0x176   :  { %v932_v58 = vadd.f32 %v931_v55, %v889_v52 }
 0x177   :  { %v933_v59 = vpop.f32.mrf.mxu0 }
 0x178   :  { %v934_v61 = vadd.f32 %v933_v59, %v891_v56  ;;  %v975_v62 = vadd.f32 %v974_v49, %v932_v58 }
 0x179   :  { %v935_v0 = vpop.f32.mrf.mxu0 }
 0x17a   :  { %v977_v2 = vadd.f32 %v976_v54, %v934_v61  ;;  %v936_v3 = vadd.f32 %v935_v0, %v893_v60  ;;  %v983_v7 = vmax.f32 %v975_v62, 0.0 }
 0x17b   :  { %v937_v4 = vpop.f32.mrf.mxu0 }
 0x17c   :  { %v984_v5 = vmax.f32 %v977_v2, 0.0  ;;  %v938_v6 = vadd.f32 %v937_v4, %v895_v1  ;;  %v979_v9 = vadd.f32 %v978_v63, %v936_v3 }
 0x17e   :  { %v981_v10 = vadd.f32 %v980_v8, %v938_v6  ;;  %1090 = vmatprep.mubr.f32.mxu1 %v984_v5  ;;  %v985_v12 = vmax.f32 %v979_v9, 0.0 }
 0x17f   :  { %1091 = vmatmul.mubr.f32.vlgmr.msra.gmra.mxu1 %v983_v7 }
 0x180   :  { %v986_v11 = vmax.f32 %v981_v10, 0.0 }
 0x182   :  { %1095 = vmatprep.mubr.f32.mxu1 %v986_v11 }
 0x183   :  { %1096 = vmatmul.mubr.f32.gmra.mxu1 %v985_v12 }
 0x23f   :  { %v1393_v19 = vpop.f32.mrf.mxu1 }
 0x241   :  { %v1394_v21 = vpop.f32.mrf.mxu1 }
 0x242   :  { %v1395_v22 = vadd.f32 %v1394_v21, %v1393_v19 }
 0x243   :  { %v1396_v23 = vpop.f32.mrf.mxu1 }
 0x244   :  { %v1093_v24 = vadd.f32 %v1395_v22, %v1359_v20 }
 0x245   :  { %v1397_v25 = vpop.f32.mrf.mxu1 }
 0x246   :  { %v1101_v26 = vmax.f32 %v1093_v24, 0.0  ;;  %v1398_v27 = vadd.f32 %v1397_v25, %v1396_v23 }
 0x248   :  { %v1098_v28 = vadd.f32 %v1398_v27, %v1359_v20  ;;  %1449 = vmatprep.mubr.f32.mxu0 %v1101_v26 }
 0x24a   :  { %v1102_v29 = vmax.f32 %v1098_v28, 0.0 }
 0x24c   :  { %1450 = vmatmul.mubr.f32.vlgmr.msra.gmra.mxu0 %v1102_v29 }
 0x30c   :  { %v1451_v30 = vpop.f32.mrf.mxu0 }
 0x30d   :  { %v1198_v34 = vadd.f32 %v1451_v30, %v1360_v31 }
 0x30e   :  { %v1192_v32 = vpop.f32.mrf.mxu0 }
 0x30f   :  { %v1193_v33 = vadd.f32 %v1360_v31, %v1192_v32 }
 0x311   :  { %1201 = vmax.xlane.f32.xlu0 %v1193_v33 }
 0x315   :  { %1203 = vmax.xlane.f32.xlu0 %v1198_v34 }
 0x39a   :  { %v1202_v35 = vpop.xlane.xlu0 %1201 }
 0x39b   :  { %v1205_v36 = vsub.f32 %v1193_v33, %v1202_v35 }
 0x39d   :  { %v1207_v37 = vmul.f32 1.442695, %v1205_v36 }
 0x39e   :  { %v1204_v38 = vpop.xlane.xlu0 %1203 }
 0x39f   :  { %1640 = vpow2.f32 %v1207_v37  ;;  %v1206_v39 = vsub.f32 %v1198_v34, %v1204_v38 }
 0x3a1   :  { %v1209_v40 = vmul.f32 1.442695, %v1206_v39 }
 0x3a3   :  { %1642 = vpow2.f32 %v1209_v40 }
 0x3ac   :  { %v1641_v41 = vpop.eup %1640 }
 0x3ad   :  { %1211 = vadd.xlane.f32.xlu1 %v1641_v41 }
 0x3b0   :  { %v1643_v42 = vpop.eup %1642 }
 0x3b1   :  { %1213 = vadd.xlane.f32.xlu1 %v1643_v42 }
 0x436   :  { %v1212_v43 = vpop.xlane.xlu1 %1211 }
 0x437   :  { %1644 = vrcp.f32 %v1212_v43 }
 0x43a   :  { %v1214_v44 = vpop.xlane.xlu1 %1213 }
 0x43b   :  { %1646 = vrcp.f32 %v1214_v44 }
 0x444   :  { %v1645_v45 = vpop.eup %1644 }
 0x445   :  { %v1217_v46 = vmul.f32 %v1645_v45, %v1641_v41 }
 0x447   :  { %1219 = vst [vmem:[#allocation10] sm:$0xff] %v1217_v46 }
 0x448   :  { %v1647_v47 = vpop.eup %1646 }
 0x449   :  { %v1218_v48 = vmul.f32 %v1647_v47, %v1643_v42 }
 0x44b   :  { %1220 = vst [vmem:[#allocation10 + $0x8] sm:$0xff] %v1218_v48 }
 0x44c   :  { %1739 = shalt.err (!%p1736_p10)
}
 0x44d   :  { %1232 = dma.vmem_to_hbm [thread:$0]  %s1227_s6, 256, %s1849_s7, [#allocation4], %s1757_s27, %s1757_s27, %s1758_s28  }
 0x44e   :  { %1754 = dma.done.wait [#allocation4], 256  }
 0x44f   :  { %1755 = vsyncadd [#allocation4], 4294967040 }
 0x450   :  { %1236 = vsyncpa [#allocation3], 1 }
 0x451   :  { %1237 = vsyncpa [#allocation6], 1 }
 0x452   :  { %1238 = vsyncpa [#allocation9], 1 }
 0x453   :  { %1239 = vsyncpa [#allocation4], 1 }

</bundles_post_ra>
